<compile_context>
chip_gen: v7x
topology: tpu7x:2x2x1
jax: 0.10.0
libtpu: 0.0.40
codegen_flags: <defaults>
</compile_context>

<pallas_src>
import jax
import jax.numpy as jnp
from jax.experimental import pallas as pl
from jax.experimental.pallas import tpu as pltpu


# --------------------------------------------------------------------------- kernels
def _onlstm_cell_kernel(xh_ref, w_ref, b_ref, aux_ref, hy_ref, cy_ref):
    """Single-timestep cell; one H-tile per grid step.

    aux_ref[0]=input floor, aux_ref[1]=forget floor, aux_ref[2]=cx, all
    pre-broadcast to (Bp, Ht) f32 and stacked so each tile needs one DMA.
    Gate columns inside the tile are interleaved [out | cell | in | forget].
    """
    Ht = hy_ref.shape[1]

    gates = jnp.dot(xh_ref[...], w_ref[...],
                    preferred_element_type=jnp.float32) + b_ref[...]

    outgate    = jax.nn.sigmoid(gates[:, 0 * Ht:1 * Ht])
    cell       = jnp.tanh(gates[:, 1 * Ht:2 * Ht])
    ingate     = jax.nn.sigmoid(gates[:, 2 * Ht:3 * Ht])
    forgetgate = jax.nn.sigmoid(gates[:, 3 * Ht:4 * Ht])

    cin = aux_ref[0]
    cfg = aux_ref[1]
    cx  = aux_ref[2]

    overlap    = cfg * cin
    forgetgate = forgetgate * overlap + (cfg - overlap)
    ingate     = ingate * overlap + (cin - overlap)

    cy = forgetgate * cx + ingate * cell
    hy = outgate * jnp.tanh(cy)

    # TODO(synk): in the weight-resident regime with Ht>=1024 the f32 gate
    # working set can spill vregs; process the gating math in 128-lane
    # sub-chunks via lax.fori_loop(unroll=True) if that becomes the bottleneck.
    hy_ref[...] = hy.astype(hy_ref.dtype)
    cy_ref[...] = cy.astype(cy_ref.dtype)


def _onlstm_seq_kernel(x_ref, wih_ref, whh_ref, b_ref, fl_ref, h0_ref, c0_ref,
                       hy_ref, cy_ref, h_scr, c_scr):
    """Fused multi-timestep forward.

    Grid iterates over T.  W_ih / W_hh / bias have constant index_maps, so they
    are DMA'd once and stay resident in VMEM for all steps; hx (compute dtype)
    and cx (f32) are carried across steps in VMEM scratch.
    """
    H = h_scr.shape[1]
    t = pl.program_id(0)

    @pl.when(t == 0)
    def _():
        h_scr[...] = h0_ref[...]
        c_scr[...] = c0_ref[...]

    gates = (jnp.dot(x_ref[0], wih_ref[...], preferred_element_type=jnp.float32)
             + jnp.dot(h_scr[...], whh_ref[...], preferred_element_type=jnp.float32)
             + b_ref[...])

    outgate    = jax.nn.sigmoid(gates[:, 0 * H:1 * H])
    cell       = jnp.tanh(gates[:, 1 * H:2 * H])
    ingate     = jax.nn.sigmoid(gates[:, 2 * H:3 * H])
    forgetgate = jax.nn.sigmoid(gates[:, 3 * H:4 * H])

    cin = fl_ref[0, 0]
    cfg = fl_ref[0, 1]

    overlap    = cfg * cin
    forgetgate = forgetgate * overlap + (cfg - overlap)
    ingate     = ingate * overlap + (cin - overlap)

    cy = forgetgate * c_scr[...] + ingate * cell
    hy = outgate * jnp.tanh(cy)

    c_scr[...] = cy                         # recurrent cell state stays f32
    h_scr[...] = hy.astype(h_scr.dtype)     # hidden carried in compute dtype

    hy_ref[0] = hy.astype(hy_ref.dtype)
    cy_ref[0] = cy.astype(cy_ref.dtype)


# --------------------------------------------------------------------------- helpers
def _round_up(n, m):
    return (n + m - 1) // m * m


def _batch_pad(dtype):
    # bf16 packs rows in sublane pairs: pad Bp to 16 for sub-32-bit streams.
    return 16 if jnp.dtype(dtype).itemsize < 4 else 8


def _weight_slab_budget():
    """Per-chip budget for the double-buffered streamed weight slab."""
    try:
        info = pltpu.get_tpu_info()
        phys = int(getattr(info, "vmem_capacity_bytes", 128 * 1024 * 1024))
    except Exception:
        phys = 128 * 1024 * 1024
    # v5e/v6e (128 MiB): 22 MiB; v7x (64 MiB): 16 MiB.
    return min(22 * 1024 * 1024, phys // 4)


def _choose_h_tile(H, K, bytes_per_el):
    """Largest lane-aligned H-tile whose double-buffered (K, 4*Ht) weight slab
    fits the per-chip budget, preferring an even number (>=2) of tiles so the
    'parallel' H-tile axis can be split across v7x's two TensorCores."""
    if H % 128 != 0:
        return H            # tiny / unaligned H (demo): one full-array block
    budget = _weight_slab_budget()
    fallback = 128
    for ht in (1024, 512, 256, 128):
        if H % ht == 0 and 2 * (K * 4 * ht) * bytes_per_el <= budget:
            n = H // ht
            if n >= 2 and n % 2 == 0:
                return ht
            fallback = max(fallback, ht)
    return fallback


def prepare_onlstm_params(params, *, input_size, hidden_size, n_chunk,
                          dropconnect=0.0, compute_dtype=jnp.bfloat16):
    """One-time parameter plumbing hoisted out of the per-timestep hot path.

    Matches tune_ONLSTMCell eval semantics exactly: hh is LinearDropConnect,
    which in eval() uses weight * (1 - dropconnect); ih is a plain Linear.
    """
    H, K_in = hidden_size, input_size
    K = K_in + H
    cdt = jnp.dtype(compute_dtype)

    # Natural-order operands for the weight-resident sequence kernel.
    w_ih_t = params["w_ih"].T.astype(cdt)                                      # (K_in, 4H)
    w_hh_t = (params["w_hh"] * (1.0 - dropconnect)).T.astype(cdt)              # (H, 4H)
    b_nat = (params["b_ih"] + params["b_hh"]).reshape(1, 4 * H).astype(jnp.float32)

    # Fused [x|hx] operand with per-H-tile gate-interleaved columns for the
    # single-step streamed kernel: tile i holds [out|cell|in|forget] for hidden
    # columns [i*h_tile, (i+1)*h_tile).
    w = jnp.concatenate([params["w_ih"].T,
                         (params["w_hh"] * (1.0 - dropconnect)).T], axis=0)    # (K, 4H) f32
    h_tile = _choose_h_tile(H, K, cdt.itemsize)
    n_tiles = H // h_tile
    w_tiled = (w.reshape(K, 4, n_tiles, h_tile).transpose(0, 2, 1, 3)
                 .reshape(K, n_tiles * 4 * h_tile).astype(cdt))
    b_tiled = (b_nat.reshape(1, 4, n_tiles, h_tile).transpose(0, 2, 1, 3)
                 .reshape(1, n_tiles * 4 * h_tile))

    # TODO(synk): int8 (v5e/v6e MXU) / fp8-e4m3 (v7x MXU) weight streams with
    # per-column scales would halve the dominant weight-DMA cost; kept bf16/f32.
    return dict(w_tiled=w_tiled, b_tiled=b_tiled, w_ih_t=w_ih_t, w_hh_t=w_hh_t,
                b_nat=b_nat, h_tile=h_tile, n_tiles=n_tiles,
                input_size=K_in, hidden_size=H, n_chunk=n_chunk,
                chunk_size=H // n_chunk, compute_dtype=cdt)


# --------------------------------------------------------------------------- single step
def onlstm_cell_forward(prep, x, hidden, input_floor, forget_floor):
    """Mirrors tune_ONLSTMCell.forward (eval mode, transformed_input=None)."""
    hx, cx = hidden
    B = hx.shape[0]
    H = prep["hidden_size"]
    Ht = prep["h_tile"]
    n_tiles = prep["n_tiles"]
    K = prep["input_size"] + H
    chunk_size = prep["chunk_size"]
    cdt = prep["compute_dtype"]

    pad_mult = _batch_pad(cdt)
    Bp = _round_up(max(B, pad_mult), pad_mult)
    # TODO(synk): once weights are resident (sequence kernel), pack several
    # sequences so Bp >= 64-128 to fill the MXU M dimension.

    xh = jnp.concatenate([x, hx], axis=1).astype(cdt)                          # (B, K)
    cin = jnp.repeat(input_floor.astype(jnp.float32), chunk_size, axis=1)      # (B, H)
    cfg = jnp.repeat(forget_floor.astype(jnp.float32), chunk_size, axis=1)     # (B, H)
    cx_flat = cx.reshape(B, H).astype(jnp.float32)

    if Bp != B:
        pad = ((0, Bp - B), (0, 0))
        xh = jnp.pad(xh, pad)
        cin = jnp.pad(cin, pad)
        cfg = jnp.pad(cfg, pad)
        cx_flat = jnp.pad(cx_flat, pad)

    aux = jnp.stack([cin, cfg, cx_flat], axis=0)                               # (3, Bp, H)

    itemsize = jnp.dtype(cdt).itemsize
    wb = prep["w_tiled"].size * prep["w_tiled"].dtype.itemsize
    cost = pl.CostEstimate(
        flops=2 * Bp * K * 4 * H,
        transcendentals=5 * Bp * H,                 # 3 sigmoid + 2 tanh per element
        bytes_accessed=(wb + xh.size * itemsize + prep["b_tiled"].size * 4
                        + aux.size * 4 + Bp * H * itemsize + Bp * H * 4))

    out_map = lambda i: (0, i)

    hy, cy_flat = pl.pallas_call(
        _onlstm_cell_kernel,
        out_shape=(jax.ShapeDtypeStruct((Bp, H), cdt),          # hy in compute dtype
                   jax.ShapeDtypeStruct((Bp, H), jnp.float32)), # cy stays f32
        grid=(n_tiles,),
        in_specs=[
            pl.BlockSpec((Bp, K), lambda i: (0, 0)),          # [x|hx]: resident across tiles
            pl.BlockSpec((K, 4 * Ht), lambda i: (0, i)),      # weight tiles: streamed/pipelined
            pl.BlockSpec((1, 4 * Ht), lambda i: (0, i)),      # fused bias tiles
            pl.BlockSpec((3, Bp, Ht), lambda i: (0, 0, i)),   # stacked cin/cfg/cx: 1 DMA/tile
        ],
        out_specs=(pl.BlockSpec((Bp, Ht), out_map),
                   pl.BlockSpec((Bp, Ht), out_map)),
        compiler_params=pltpu.CompilerParams(
            dimension_semantics=("parallel",),                # v7x: split H-tiles across TCs
            vmem_limit_bytes=32 * 1024 * 1024),
        cost_estimate=cost,
    )(xh, prep["w_tiled"], prep["b_tiled"], aux)

    hy = hy[:B]
    cy = cy_flat[:B].reshape(B, prep["n_chunk"], chunk_size)
    return hy, cy


# --------------------------------------------------------------------------- fused sequence
def onlstm_sequence_forward(prep, xs, hidden0, input_floors, forget_floors):
    """Apply the cell over T timesteps in one pallas_call: weights resident in
    VMEM across steps, hx/cx carried in VMEM scratch (perf-review item #1)."""
    hx0, cx0 = hidden0
    T, B, K_in = xs.shape
    H = prep["hidden_size"]
    chunk_size = prep["chunk_size"]
    cdt = prep["compute_dtype"]

    pad_mult = _batch_pad(cdt)
    Bp = _round_up(max(B, pad_mult), pad_mult)

    xs_p = xs.astype(cdt)                                                       # (T, B, K_in)
    cin = jnp.repeat(input_floors.astype(jnp.float32), chunk_size, axis=2)      # (T, B, H)
    cfg = jnp.repeat(forget_floors.astype(jnp.float32), chunk_size, axis=2)
    fl = jnp.stack([cin, cfg], axis=1)                                          # (T, 2, B, H)
    h0 = hx0.astype(cdt)
    c0 = cx0.reshape(B, H).astype(jnp.float32)

    if Bp != B:
        xs_p = jnp.pad(xs_p, ((0, 0), (0, Bp - B), (0, 0)))
        fl = jnp.pad(fl, ((0, 0), (0, 0), (0, Bp - B), (0, 0)))
        h0 = jnp.pad(h0, ((0, Bp - B), (0, 0)))
        c0 = jnp.pad(c0, ((0, Bp - B), (0, 0)))

    itemsize = jnp.dtype(cdt).itemsize
    w_bytes = (prep["w_ih_t"].size + prep["w_hh_t"].size) * itemsize
    # Resident weights + pipelined activations must fit scoped VMEM; cap at
    # 48 MiB so there is headroom under v7x's 64 MiB physical VMEM.
    vmem_lim = int(min(48 * 1024 * 1024,
                       max(32 * 1024 * 1024, 3 * w_bytes + 8 * 1024 * 1024)))

    cost = pl.CostEstimate(
        flops=2 * T * Bp * (K_in + H) * 4 * H,
        transcendentals=5 * T * Bp * H,
        bytes_accessed=(w_bytes + prep["b_nat"].size * 4
                        + T * (Bp * K_in * itemsize + 2 * Bp * H * 4
                               + Bp * H * itemsize + Bp * H * 4)))

    hy_seq, cy_seq = pl.pallas_call(
        _onlstm_seq_kernel,
        out_shape=(jax.ShapeDtypeStruct((T, Bp, H), cdt),
                   jax.ShapeDtypeStruct((T, Bp, H), jnp.float32)),
        grid=(T,),
        in_specs=[
            pl.BlockSpec((1, Bp, K_in), lambda t: (t, 0, 0)),     # x_t: streamed per step
            pl.BlockSpec((K_in, 4 * H), lambda t: (0, 0)),        # W_ih: resident (1 DMA)
            pl.BlockSpec((H, 4 * H), lambda t: (0, 0)),           # W_hh: resident (1 DMA)
            pl.BlockSpec((1, 4 * H), lambda t: (0, 0)),           # bias: resident
            pl.BlockSpec((1, 2, Bp, H), lambda t: (t, 0, 0, 0)),  # floors: streamed per step
            pl.BlockSpec((Bp, H), lambda t: (0, 0)),              # h0 (read at t==0)
            pl.BlockSpec((Bp, H), lambda t: (0, 0)),              # c0 (read at t==0)
        ],
        out_specs=(pl.BlockSpec((1, Bp, H), lambda t: (t, 0, 0)),
                   pl.BlockSpec((1, Bp, H), lambda t: (t, 0, 0))),
        scratch_shapes=[pltpu.VMEM((Bp, H), cdt),                 # hx carry
                        pltpu.VMEM((Bp, H), jnp.float32)],        # cx carry (f32)
        compiler_params=pltpu.CompilerParams(
            dimension_semantics=("arbitrary",),                   # sequential recurrence
            vmem_limit_bytes=vmem_lim),
        cost_estimate=cost,
    )(xs_p, prep["w_ih_t"], prep["w_hh_t"], prep["b_nat"], fl, h0, c0)

    hy_seq = hy_seq[:, :B]
    cy_seq = cy_seq[:, :B].reshape(T, B, prep["n_chunk"], chunk_size)
    return hy_seq, cy_seq


# --------------------------------------------------------------------------- references
def reference_forward(params, x, hidden, input_floor, forget_floor,
                      *, n_chunk, dropconnect=0.0):
    """Pure-JAX f32 reference replicating the PyTorch forward exactly."""
    hx, cx = hidden
    B, H = hx.shape
    chunk_size = H // n_chunk
    ti = x @ params["w_ih"].T + params["b_ih"]
    gates = ti + hx @ (params["w_hh"] * (1.0 - dropconnect)).T + params["b_hh"]
    g = gates.reshape(B, 4 * n_chunk, chunk_size)
    outgate, cell, ingate, forgetgate = (g[:, 0 * n_chunk:1 * n_chunk],
                                         g[:, 1 * n_chunk:2 * n_chunk],
                                         g[:, 2 * n_chunk:3 * n_chunk],
                                         g[:, 3 * n_chunk:4 * n_chunk])
    cin = input_floor[:, :, None]
    cfg = forget_floor[:, :, None]
    ingate = jax.nn.sigmoid(ingate)
    forgetgate = jax.nn.sigmoid(forgetgate)
    cell = jnp.tanh(cell)
    outgate = jax.nn.sigmoid(outgate)
    overlap = cfg * cin
    forgetgate = forgetgate * overlap + (cfg - overlap)
    ingate = ingate * overlap + (cin - overlap)
    cy = forgetgate * cx + ingate * cell
    hy = outgate * jnp.tanh(cy)
    return hy.reshape(B, H), cy


def reference_sequence(params, xs, hidden0, input_floors, forget_floors,
                       *, n_chunk, dropconnect=0.0):
    hx, cx = hidden0
    hys, cys = [], []
    for t in range(xs.shape[0]):
        hy, cy = reference_forward(params, xs[t], (hx, cx),
                                   input_floors[t], forget_floors[t],
                                   n_chunk=n_chunk, dropconnect=dropconnect)
        hx, cx = hy, cy
        hys.append(hy)
        cys.append(cy)
    return jnp.stack(hys), jnp.stack(cys)


# --------------------------------------------------------------------------- demo
if __name__ == "__main__":
    B, input_size, hidden_size, n_chunk, T = 2, 16, 32, 4, 6
    chunk_size = hidden_size // n_chunk
    dropconnect = 0.0

    key = jax.random.PRNGKey(0)
    ks = jax.random.split(key, 12)
    params = {
        "w_ih": jax.random.normal(ks[0], (4 * hidden_size, input_size), jnp.float32) * 0.1,
        "b_ih": jax.random.normal(ks[1], (4 * hidden_size,), jnp.float32) * 0.1,
        "w_hh": jax.random.normal(ks[2], (4 * hidden_size, hidden_size), jnp.float32) * 0.1,
        "b_hh": jax.random.normal(ks[3], (4 * hidden_size,), jnp.float32) * 0.1,
    }
    x = jax.random.normal(ks[4], (B, input_size), jnp.float32)
    hx = jax.random.normal(ks[5], (B, hidden_size), jnp.float32)
    cx = jax.random.normal(ks[6], (B, n_chunk, chunk_size), jnp.float32)
    input_floor = jax.nn.sigmoid(jax.random.normal(ks[7], (B, n_chunk), jnp.float32))
    forget_floor = jax.nn.sigmoid(jax.random.normal(ks[8], (B, n_chunk), jnp.float32))

    hy_ref, cy_ref = reference_forward(params, x, (hx, cx), input_floor, forget_floor,
                                       n_chunk=n_chunk, dropconnect=dropconnect)

    # --- single-step kernel, f32 streaming (tight check vs reference) ---
    prep_f32 = prepare_onlstm_params(params, input_size=input_size,
                                     hidden_size=hidden_size, n_chunk=n_chunk,
                                     dropconnect=dropconnect,
                                     compute_dtype=jnp.float32)
    hy, cy = onlstm_cell_forward(prep_f32, x, (hx, cx), input_floor, forget_floor)
    jax.block_until_ready((hy, cy))
    assert hy.shape == (B, hidden_size) and cy.shape == (B, n_chunk, chunk_size)
    assert jnp.allclose(hy, hy_ref, atol=1e-5, rtol=1e-5)
    assert jnp.allclose(cy, cy_ref, atol=1e-5, rtol=1e-5)

    # --- single-step kernel, bf16 weight stream (hy emitted in bf16, cy f32) ---
    prep_bf16 = prepare_onlstm_params(params, input_size=input_size,
                                      hidden_size=hidden_size, n_chunk=n_chunk,
                                      dropconnect=dropconnect,
                                      compute_dtype=jnp.bfloat16)
    hy2, cy2 = onlstm_cell_forward(prep_bf16, x, (hx, cx), input_floor, forget_floor)
    jax.block_until_ready((hy2, cy2))
    assert jnp.allclose(hy2.astype(jnp.float32), hy_ref, atol=2e-2, rtol=2e-2)
    assert jnp.allclose(cy2, cy_ref, atol=2e-2, rtol=2e-2)

    # --- fused multi-timestep kernel (weights resident in VMEM across T steps) ---
    xs = jax.random.normal(ks[9], (T, B, input_size), jnp.float32)
    in_floors = jax.nn.sigmoid(jax.random.normal(ks[10], (T, B, n_chunk), jnp.float32))
    fg_floors = jax.nn.sigmoid(jax.random.normal(ks[11], (T, B, n_chunk), jnp.float32))
    hy_seq_ref, cy_seq_ref = reference_sequence(params, xs, (hx, cx), in_floors, fg_floors,
                                                n_chunk=n_chunk, dropconnect=dropconnect)

    hy_seq, cy_seq = onlstm_sequence_forward(prep_f32, xs, (hx, cx), in_floors, fg_floors)
    jax.block_until_ready((hy_seq, cy_seq))
    assert hy_seq.shape == (T, B, hidden_size)
    assert cy_seq.shape == (T, B, n_chunk, chunk_size)
    assert jnp.allclose(hy_seq, hy_seq_ref, atol=1e-4, rtol=1e-4)
    assert jnp.allclose(cy_seq, cy_seq_ref, atol=1e-4, rtol=1e-4)

    hy_seq2, cy_seq2 = onlstm_sequence_forward(prep_bf16, xs, (hx, cx), in_floors, fg_floors)
    jax.block_until_ready((hy_seq2, cy_seq2))
    assert jnp.allclose(hy_seq2.astype(jnp.float32), hy_seq_ref, atol=5e-2, rtol=5e-2)
    assert jnp.allclose(cy_seq2, cy_seq_ref, atol=5e-2, rtol=5e-2)

    print("KERNEL_OK")
</pallas_src>

<mosaic_0001>
module attributes {stable_mosaic.version = 11 : i64} {
  func.func @_onlstm_cell_kernel(%arg0: i32, %arg1: memref<8x48xf32, #tpu.memory_space<vmem>>, %arg2: memref<48x128xf32, #tpu.memory_space<vmem>>, %arg3: memref<1x128xf32, #tpu.memory_space<vmem>>, %arg4: memref<3x8x32xf32, #tpu.memory_space<vmem>>, %arg5: memref<8x32xf32, #tpu.memory_space<vmem>>, %arg6: memref<8x32xf32, #tpu.memory_space<vmem>>) attributes {dimension_semantics = [#tpu.dimension_semantics<parallel>], iteration_bounds = array<i64: 1>, scalar_prefetch = 0 : i64, scratch_operands = 0 : i64, tpu.core_type = #tpu.core_type<tc>, window_params = [{pipeline_mode = #tpu.pipeline_mode<synchronous>, transform_indices = @transform_0, window_bounds = array<i64: 8, 48>}, {transform_indices = @transform_1, window_bounds = array<i64: 48, 128>}, {transform_indices = @transform_2, window_bounds = array<i64: 1, 128>}, {transform_indices = @transform_3, window_bounds = array<i64: 3, 8, 32>}, {transform_indices = @transform_4, window_bounds = array<i64: 8, 32>}, {transform_indices = @transform_5, window_bounds = array<i64: 8, 32>}]} {
    %c0 = arith.constant 0 : index
    %c0_0 = arith.constant 0 : index
    %0 = vector.load %arg1[%c0, %c0_0] : memref<8x48xf32, #tpu.memory_space<vmem>>, vector<8x48xf32>
    %c0_1 = arith.constant 0 : index
    %c0_2 = arith.constant 0 : index
    %1 = vector.load %arg2[%c0_1, %c0_2] : memref<48x128xf32, #tpu.memory_space<vmem>>, vector<48x128xf32>
    %cst = arith.constant dense<0.000000e+00> : vector<8x128xf32>
    %2 = tpu.matmul %0, %1, %cst {dimension_numbers = #tpu.dot_dimension_numbers<[1], [0], [0], [1], [0, 0, 1, 1], [], []>} : vector<8x48xf32>, vector<48x128xf32>, vector<8x128xf32> -> vector<8x128xf32>
    %c0_3 = arith.constant 0 : index
    %c0_4 = arith.constant 0 : index
    %3 = vector.load %arg3[%c0_3, %c0_4] : memref<1x128xf32, #tpu.memory_space<vmem>>, vector<1x128xf32>
    %4 = vector.broadcast %3 : vector<1x128xf32> to vector<8x128xf32>
    %5 = arith.addf %2, %4 : vector<8x128xf32>
    %6 = vector.extract_strided_slice %5 {offsets = [0, 0], sizes = [8, 32], strides = [1, 1]} : vector<8x128xf32> to vector<8x32xf32>
    %7 = arith.negf %6 : vector<8x32xf32>
    %8 = math.exp %7 : vector<8x32xf32>
    %cst_5 = arith.constant 1.000000e+00 : f32
    %9 = vector.broadcast %cst_5 : f32 to vector<8x32xf32>
    %10 = arith.addf %9, %8 : vector<8x32xf32>
    %11 = arith.divf %9, %10 : vector<8x32xf32>
    %12 = vector.extract_strided_slice %5 {offsets = [0, 32], sizes = [8, 32], strides = [1, 1]} : vector<8x128xf32> to vector<8x32xf32>
    %13 = math.tanh %12 : vector<8x32xf32>
    %14 = vector.extract_strided_slice %5 {offsets = [0, 64], sizes = [8, 32], strides = [1, 1]} : vector<8x128xf32> to vector<8x32xf32>
    %15 = arith.negf %14 : vector<8x32xf32>
    %16 = math.exp %15 : vector<8x32xf32>
    %cst_6 = arith.constant 1.000000e+00 : f32
    %17 = vector.broadcast %cst_6 : f32 to vector<8x32xf32>
    %18 = arith.addf %17, %16 : vector<8x32xf32>
    %19 = arith.divf %17, %18 : vector<8x32xf32>
    %20 = vector.extract_strided_slice %5 {offsets = [0, 96], sizes = [8, 32], strides = [1, 1]} : vector<8x128xf32> to vector<8x32xf32>
    %21 = arith.negf %20 : vector<8x32xf32>
    %22 = math.exp %21 : vector<8x32xf32>
    %cst_7 = arith.constant 1.000000e+00 : f32
    %23 = vector.broadcast %cst_7 : f32 to vector<8x32xf32>
    %24 = arith.addf %23, %22 : vector<8x32xf32>
    %25 = arith.divf %23, %24 : vector<8x32xf32>
    %c0_8 = arith.constant 0 : index
    %c0_9 = arith.constant 0 : index
    %c0_10 = arith.constant 0 : index
    %26 = vector.load %arg4[%c0_8, %c0_9, %c0_10] : memref<3x8x32xf32, #tpu.memory_space<vmem>>, vector<1x8x32xf32>
    %27 = vector.shape_cast %26 : vector<1x8x32xf32> to vector<8x32xf32>
    %c1 = arith.constant 1 : index
    %c0_11 = arith.constant 0 : index
    %c0_12 = arith.constant 0 : index
    %28 = vector.load %arg4[%c1, %c0_11, %c0_12] : memref<3x8x32xf32, #tpu.memory_space<vmem>>, vector<1x8x32xf32>
    %29 = vector.shape_cast %28 : vector<1x8x32xf32> to vector<8x32xf32>
    %c2 = arith.constant 2 : index
    %c0_13 = arith.constant 0 : index
    %c0_14 = arith.constant 0 : index
    %30 = vector.load %arg4[%c2, %c0_13, %c0_14] : memref<3x8x32xf32, #tpu.memory_space<vmem>>, vector<1x8x32xf32>
    %31 = vector.shape_cast %30 : vector<1x8x32xf32> to vector<8x32xf32>
    %32 = arith.mulf %29, %27 : vector<8x32xf32>
    %33 = arith.mulf %25, %32 : vector<8x32xf32>
    %34 = arith.subf %29, %32 : vector<8x32xf32>
    %35 = arith.addf %33, %34 : vector<8x32xf32>
    %36 = arith.mulf %19, %32 : vector<8x32xf32>
    %37 = arith.subf %27, %32 : vector<8x32xf32>
    %38 = arith.addf %36, %37 : vector<8x32xf32>
    %39 = arith.mulf %35, %31 : vector<8x32xf32>
    %40 = arith.mulf %38, %13 : vector<8x32xf32>
    %41 = arith.addf %39, %40 : vector<8x32xf32>
    %42 = math.tanh %41 : vector<8x32xf32>
    %43 = arith.mulf %11, %42 : vector<8x32xf32>
    %c0_15 = arith.constant 0 : index
    %c0_16 = arith.constant 0 : index
    %44 = vector.load %arg5[%c0_15, %c0_16] : memref<8x32xf32, #tpu.memory_space<vmem>>, vector<8x32xf32>
    tpu.vector_store %arg5[%c0_15, %c0_16], %43 {strides = array<i32>} : memref<8x32xf32, #tpu.memory_space<vmem>>, vector<8x32xf32>,
    %c0_17 = arith.constant 0 : index
    %c0_18 = arith.constant 0 : index
    %45 = vector.load %arg6[%c0_17, %c0_18] : memref<8x32xf32, #tpu.memory_space<vmem>>, vector<8x32xf32>
    tpu.vector_store %arg6[%c0_17, %c0_18], %41 {strides = array<i32>} : memref<8x32xf32, #tpu.memory_space<vmem>>, vector<8x32xf32>,
    return
  }
  func.func @transform_0(%arg0: i32) -> (i32, i32) {
    %c0_i32 = arith.constant 0 : i32
    %c0_i32_0 = arith.constant 0 : i32
    %c0_i32_1 = arith.constant 0 : i32
    return %c0_i32, %c0_i32_0 : i32, i32
  }
  func.func @transform_1(%arg0: i32) -> (i32, i32) {
    %c0_i32 = arith.constant 0 : i32
    %c0_i32_0 = arith.constant 0 : i32
    return %c0_i32, %arg0 : i32, i32
  }
  func.func @transform_2(%arg0: i32) -> (i32, i32) {
    %c0_i32 = arith.constant 0 : i32
    %c0_i32_0 = arith.constant 0 : i32
    return %c0_i32, %arg0 : i32, i32
  }
  func.func @transform_3(%arg0: i32) -> (i32, i32, i32) {
    %c0_i32 = arith.constant 0 : i32
    %c0_i32_0 = arith.constant 0 : i32
    %c0_i32_1 = arith.constant 0 : i32
    return %c0_i32, %c0_i32_0, %arg0 : i32, i32, i32
  }
  func.func @transform_4(%arg0: i32) -> (i32, i32) {
    %c0_i32 = arith.constant 0 : i32
    %c0_i32_0 = arith.constant 0 : i32
    return %c0_i32, %arg0 : i32, i32
  }
  func.func @transform_5(%arg0: i32) -> (i32, i32) {
    %c0_i32 = arith.constant 0 : i32
    %c0_i32_0 = arith.constant 0 : i32
    return %c0_i32, %arg0 : i32, i32
  }
}

</mosaic_0001>

<bundles_post_ra>
// kernel: tpu_custom_call.1
= control target key start
LH: loop header
LB: loop body
LE: loop exit
PB: predicated region body
PF: predicated region fallthrough
CT: control target
= control target key end

     0   :  { %11 = vsyncpa [#allocation3], 0  ;;  %s527_s0 = inlined_call_operand.hbm [shape: f32[8,48], index: 0, kind: input, shape index: {}]   ;;  %s528_s1 = inlined_call_operand.hbm [shape: f32[48,128], index: 1, kind: input, shape index: {}]   ;;  %s529_s2 = inlined_call_operand.vmem [shape: f32[1,128], index: 2, kind: input, shape index: {}]   ;;  %s530_s3 = inlined_call_operand.hbm [shape: f32[3,8,32], index: 3, kind: input, shape index: {}]   ;;  %s531_s4 = inlined_call_operand.hbm [shape: f32[8,32], index: 4, kind: output, shape index: {0}]   ;;  %s532_s5 = inlined_call_operand.hbm [shape: f32[8,32], index: 5, kind: output, shape index: {1}]  }
   0x1   :  { %12 = vsyncpa [#allocation6], 0 }
   0x2   :  { %13 = vsyncpa [#allocation4], 0 }
   0x3   :  { %14 = vsyncpa [#allocation10], 0  ;;  %s413_s18 = smov [#allocation5]   ;;  %s295_s22 = scalar_lea.hbm %s528_s1, 768 }
   0x4   :  { %s30_s19 = sshll.u32 %s413_s18, 4  ;;  %p296_p0 = scmp.ne.s32.totalorder %s528_s1, %s295_s22  ;;  %s31_s19 = int_to_ptr.vmem [resolvable:$true] %s30_s19 }
   0x5   :  { %p299_p1 = scmp.lt.u32.totalorder %s295_s22, %s528_s1 }
   0x7   :  { %p301_p2 = pnand %p299_p1, %p296_p0 }
   0x9   :  { %304 = shalt.err (!%p301_p2)
}
   0xa   :  { %s305_s27 = scalar_lea.vmem %s31_s19, 768  ;;  %p310_p4 = scmp.lt.s32.totalorder %s31_s19, %s31_s19 }
   0xb   :  { %p306_p3 = scmp.ne.s32.totalorder %s31_s19, %s305_s27  ;;  %p311_p5 = scmp.lt.s32.totalorder %s305_s27, %s305_s27 }
   0xd   :  { %p312_p6 = por %p311_p5, %p310_p4 }
   0xf   :  { %p313_p7 = pnand %p312_p6, %p306_p3 }
  0x11   :  { %316 = shalt.err (!%p313_p7)
}
  0x12   :  { %s414_s28 = smov 128   ;;  %s415_s29 = smov 8  }
  0x13   :  { %36 = dma.hbm_to_vmem [thread:$0]  %s528_s1, 768, %s31_s19, [#allocation6], %s414_s28, %s414_s28, %s415_s29  }
  0x14   :  { %s416_s7 = smov [#allocation2]   ;;  %s417_s9 = smov [#allocation7]  }
  0x15   :  { %s21_s8 = sshll.u32 %s416_s7, 4  ;;  %s44_s10 = sshll.u32 %s417_s9, 4  ;;  %s22_s8 = int_to_ptr.vmem [resolvable:$true] %s21_s8  ;;  %s45_s10 = int_to_ptr.vmem [resolvable:$true] %s44_s10 }
  0x16   :  { %s317_s13 = scalar_lea.hbm %s527_s0, 128 }
  0x17   :  { %p318_p8 = scmp.ne.s32.totalorder %s527_s0, %s317_s13  ;;  %p321_p9 = scmp.lt.u32.totalorder %s317_s13, %s527_s0 }
  0x19   :  { %p323_p10 = pnand %p321_p9, %p318_p8 }
  0x1b   :  { %326 = shalt.err (!%p323_p10)
}
  0x1c   :  { %s327_s1 = scalar_lea.vmem %s22_s8, 128  ;;  %p332_p12 = scmp.lt.s32.totalorder %s22_s8, %s22_s8 }
  0x1d   :  { %p328_p11 = scmp.ne.s32.totalorder %s22_s8, %s327_s1  ;;  %p333_p13 = scmp.lt.s32.totalorder %s327_s1, %s327_s1 }
  0x1f   :  { %p334_p0 = por %p333_p13, %p332_p12 }
  0x21   :  { %p335_p1 = pnand %p334_p0, %p328_p11 }
  0x23   :  { %338 = shalt.err (!%p335_p1)
}
  0x24   :  { %24 = dma.hbm_to_vmem [thread:$0]  %s527_s0, 128, %s22_s8, [#allocation3]  }
  0x25   :  { %s339_s22 = scalar_lea.hbm %s530_s3, 384 }
  0x26   :  { %p340_p2 = scmp.ne.s32.totalorder %s530_s3, %s339_s22  ;;  %p343_p3 = scmp.lt.u32.totalorder %s339_s22, %s530_s3 }
  0x28   :  { %p345_p4 = pnand %p343_p3, %p340_p2 }
  0x2a   :  { %348 = shalt.err (!%p345_p4)
}
  0x2b   :  { %s349_s27 = scalar_lea.vmem %s45_s10, 384  ;;  %p354_p6 = scmp.lt.s32.totalorder %s45_s10, %s45_s10 }
  0x2c   :  { %p350_p5 = scmp.ne.s32.totalorder %s45_s10, %s349_s27  ;;  %p355_p7 = scmp.lt.s32.totalorder %s349_s27, %s349_s27 }
  0x2e   :  { %p356_p8 = por %p355_p7, %p354_p6 }
  0x30   :  { %p357_p9 = pnand %p356_p8, %p350_p5 }
  0x32   :  { %360 = shalt.err (!%p357_p9)
}
  0x33   :  { %50 = dma.hbm_to_vmem [thread:$0]  %s530_s3, 384, %s45_s10, [#allocation6], %s414_s28, %s414_s28, %s415_s29  }
  0x34   :  { %405 = dma.done.wait [#allocation3], 128  }
  0x35   :  { %406 = vsyncadd [#allocation3], 4294967168 }
  0x36   :  { %407 = dma.done.wait [#allocation6], 1152  }
  0x37   :  { %408 = vsyncadd [#allocation6], 4294966144  ;;  %v418_v0 = vmov 0.0|0.0   ;;  %vm419_vm0 = vmmov 0   ;;  %v420_v1 = vmov 0.0   ;;  %v61_v2 = vld [vmem:[#allocation5] sm:$0xff] }
  0x38   :  { %265 = vmatprep.subr.bf16.mxu0 %v418_v0  ;;  %262 = vmatprep.mubr.msk.f32.mxu0 %vm419_vm0, %v420_v1  ;;  %v62_v3 = vld [vmem:[#allocation5 + $0x8] sm:$0xff]  ;;  %v63_v4 = vld [vmem:[#allocation5 + $0x10] sm:$0xff]  ;;  %v64_v6 = vld [vmem:[#allocation5 + $0x18] sm:$0xff]  ;;  %s421_s3 = smov 64   ;;  %vm74_vm1 = vcmask 392192   ;;  %s422_s28 = smov 96  }
  0x39   :  { %v266_v5 = vpack.c.bf16 %v62_v3, %v61_v2  ;;  %v155_v7 = vld [vmem:[#allocation7] sm:$0xff]  ;;  %v157_v8 = vld [vmem:[#allocation7 + $0x8] sm:$0xff]  ;;  %v269_v9 = vpack.c.bf16 %v64_v6, %v63_v4  ;;  %v65_v11 = vld [vmem:[#allocation5 + $0x20] sm:$0xff]  ;;  %s423_s7 = smov 32   ;;  %vm203_vm2 = vcmask 261120  }
  0x3a   :  { %v160_v10 = vmul.f32 %v157_v8, %v155_v7  ;;  %v66_v12 = vld [vmem:[#allocation5 + $0x28] sm:$0xff]  ;;  %v60_v15 = vld [vmem:[#allocation2] sm:$0xff]  ;;  %v159_v22 = vld [vmem:[#allocation7 + $0x10] sm:$0xff] }
  0x3b   :  { %267 = vmatpush3.bf16.msra.mxu0 %v266_v5  ;;  %v272_v14 = vpack.c.bf16 %v66_v12, %v65_v11  ;;  %v240_v17 = vld [vmem:[%s529_s2] ss:$0 sm:$0xff]  ;;  %s424_s2 = smov [#allocation9]  }
  0x3c   :  { %268 = vmatprep.subr.bf16.mxu0 %v418_v0  ;;  %172 = vrot.lane.b32.xlu0 %v160_v10, %s421_s3  ;;  %v176_v13 = vsub.f32 %v155_v7, %v160_v10  ;;  %v166_v16 = vsub.f32 %v157_v8, %v160_v10  ;;  %s226_s8 = sshll.u32 %s424_s2, 4  ;;  %s227_s8 = int_to_ptr.vmem [resolvable:$true] %s226_s8 }
  0x3d   :  { %s361_s9 = scalar_lea.vmem %s227_s8, 128  ;;  %p366_p11 = scmp.lt.s32.totalorder %s227_s8, %s227_s8 }
  0x3e   :  { %p362_p10 = scmp.ne.s32.totalorder %s227_s8, %s361_s9  ;;  %p367_p12 = scmp.lt.s32.totalorder %s361_s9, %s361_s9 }
  0x3f   :  { %270 = vmatpush3.bf16.msra.mxu0 %v269_v9 }
  0x40   :  { %271 = vmatprep.subr.bf16.mxu0 %v418_v0  ;;  %178 = vrot.lane.b32.xlu0 %v176_v13, %s421_s3  ;;  %p368_p13 = por %p367_p12, %p366_p11 }
  0x42   :  { %p369_p0 = pnand %p368_p13, %p362_p10 }
  0x43   :  { %273 = vmatpush3.bf16.msra.mxu0 %v272_v14 }
  0x44   :  { %168 = vrot.lane.b32.xlu0 %v166_v16, %s422_s28 }
  0x46   :  { %263 = vmatmul.mubr.msk.f32.vlgmr.msra.gmra.mrb[0].mxu0 %vm74_vm1, %v60_v15 }
  0xae   :  { %v173_v26 = vpop.permute.xlu0 %172 }
  0xb2   :  { %v179_v29 = vpop.permute.xlu0 %178 }
  0xb6   :  { %v169_v35 = vpop.permute.xlu0 %168 }
 0x119   :  { %v144_v18 = vpop.f32.mrb[0].mxu0 }
 0x11a   :  { %v145_v19 = vadd.f32 %v240_v17, %v144_v18  ;;  %v264_v20 = vpop.f32.mrb[1].mxu0 }
 0x11c   :  { %287 = vtanh.f32 %v145_v19  ;;  %v242_v23 = vmul.f32 -1.442695, %v145_v19 }
 0x11e   :  { %289 = vpow2.f32 %v242_v23 }
 0x126   :  { %v288_v21 = vpop.eup %287 }
 0x127   :  { %188 = vrot.lane.b32.xlu1 %v288_v21, %s423_s7 }
 0x128   :  { %v290_v24 = vpop.eup %289 }
 0x129   :  { %v151_v25 = vadd.f32 1.0, %v290_v24 }
 0x12b   :  { %162 = vrot.lane.b32.xlu1 %v160_v10, %s422_s28  ;;  %291 = vrcp.f32 %v151_v25 }
 0x12f   :  { %183 = vrot.lane.b32.xlu1 %v159_v22, %s422_s28 }
 0x135   :  { %v292_v27 = vpop.eup %291 }
 0x136   :  { %v175_v28 = vmul.f32 %v292_v27, %v173_v26 }
 0x138   :  { %v181_v30 = vadd.f32 %v179_v29, %v175_v28 }
 0x199   :  { %v189_v31 = vpop.permute.xlu1 %188 }
 0x19a   :  { %v191_v32 = vmul.f32 %v189_v31, %v181_v30 }
 0x19c   :  { %193 = vrot.lane.b32.xlu0 %v191_v32, %s423_s7 }
 0x19d   :  { %v163_v33 = vpop.permute.xlu1 %162 }
 0x19e   :  { %v165_v34 = vmul.f32 %v292_v27, %v163_v33 }
 0x1a0   :  { %v171_v36 = vadd.f32 %v169_v35, %v165_v34 }
 0x1a1   :  { %v184_v37 = vpop.permute.xlu1 %183 }
 0x1a2   :  { %v186_v38 = vmul.f32 %v184_v37, %v171_v36 }
 0x20e   :  { %v194_v39 = vpop.permute.xlu0 %193 }
 0x20f   :  { %v196_v40 = vadd.f32 %v194_v39, %v186_v38 }
 0x211   :  { %293 = vtanh.f32 %v196_v40  ;;  %206 = vrot.lane.b32.xlu0 %v196_v40, %s423_s7 }
 0x21b   :  { %v294_v41 = vpop.eup %293 }
 0x21c   :  { %199 = vrot.lane.b32.xlu1 %v294_v41, %s423_s7 }
 0x283   :  { %v207_v42 = vpop.permute.xlu0 %206 }
 0x284   :  { %209 = vst.msk [vmem:[#allocation9] sm:$0xff] %vm203_vm2, %v207_v42 }
 0x285   :  { %372 = shalt.err (!%p369_p0)
}
 0x286   :  { %s373_s12 = scalar_lea.hbm %s532_s5, 128 }
 0x287   :  { %p374_p1 = scmp.ne.s32.totalorder %s532_s5, %s373_s12  ;;  %p377_p2 = scmp.lt.u32.totalorder %s373_s12, %s532_s5 }
 0x289   :  { %p379_p3 = pnand %p377_p2, %p374_p1 }
 0x28b   :  { %382 = shalt.err (!%p379_p3)
}
 0x28c   :  { %229 = dma.vmem_to_hbm [thread:$0]  %s227_s8, 128, %s532_s5, [#allocation10]  }
 0x28d   :  { %s425_s18 = smov [#allocation8]  }
 0x28e   :  { %s216_s19 = sshll.u32 %s425_s18, 4  ;;  %v200_v43 = vpop.permute.xlu1 %199  ;;  %s217_s19 = int_to_ptr.vmem [resolvable:$true] %s216_s19 }
 0x28f   :  { %v202_v44 = vmul.f32 %v292_v27, %v200_v43  ;;  %s383_s20 = scalar_lea.vmem %s217_s19, 128  ;;  %p388_p5 = scmp.lt.s32.totalorder %s217_s19, %s217_s19 }
 0x290   :  { %p384_p4 = scmp.ne.s32.totalorder %s217_s19, %s383_s20  ;;  %p389_p6 = scmp.lt.s32.totalorder %s383_s20, %s383_s20 }
 0x291   :  { %204 = vst.msk [vmem:[#allocation8] sm:$0xff] %vm203_vm2, %v202_v44 }
 0x292   :  { %p390_p7 = por %p389_p6, %p388_p5 }
 0x294   :  { %p391_p8 = pnand %p390_p7, %p384_p4 }
 0x296   :  { %394 = shalt.err (!%p391_p8)
}
 0x297   :  { %s395_s23 = scalar_lea.hbm %s531_s4, 128 }
 0x298   :  { %p396_p9 = scmp.ne.s32.totalorder %s531_s4, %s395_s23  ;;  %p399_p10 = scmp.lt.u32.totalorder %s395_s23, %s531_s4 }
 0x29a   :  { %p401_p11 = pnand %p399_p10, %p396_p9 }
 0x29c   :  { %404 = shalt.err (!%p401_p11)
}
 0x29d   :  { %219 = dma.vmem_to_hbm [thread:$0]  %s217_s19, 128, %s531_s4, [#allocation4]  }
 0x29e   :  { %409 = dma.done.wait [#allocation4], 128  }
 0x29f   :  { %410 = vsyncadd [#allocation4], 4294967168 }
 0x2a0   :  { %411 = dma.done.wait [#allocation10], 128  }
 0x2a1   :  { %412 = vsyncadd [#allocation10], 4294967168 }
 0x2a2   :  { %236 = vsyncpa [#allocation3], 1 }
 0x2a3   :  { %237 = vsyncpa [#allocation6], 1 }
 0x2a4   :  { %238 = vsyncpa [#allocation4], 1 }
 0x2a5   :  { %239 = vsyncpa [#allocation10], 1 }

</bundles_post_ra>
